<compile_context>
chip_gen: v7x
topology: tpu7x:2x2x1
jax: 0.10.0
libtpu: 0.0.40
codegen_flags: <defaults>
</compile_context>

<pallas_src>
import functools
import math

import jax
import jax.numpy as jnp
from jax import lax
from jax.experimental import pallas as pl
from jax.experimental.pallas import tpu as pltpu

BN_EPS = 1e-5

# 48 MiB scoped VMEM: fits v7x (64 MiB physical) with headroom; fine on v5e/v6e.
_MM_PARAMS = pltpu.CompilerParams(
    dimension_semantics=("parallel", "parallel"),
    vmem_limit_bytes=48 * 1024 * 1024,
)


def _round_up(x, m):
    return (x + m - 1) // m * m


def _apad(c):
    """Pad 64-channel activations to 128 lanes (all other counts already >=128)."""
    return 128 if c < 128 else c


# ----------------------------------------------------------------------------
# Pallas kernels
# ----------------------------------------------------------------------------
def _mm_kernel(x_ref, w_ref, b_ref, o_ref, *, relu_out):
    # BN scale is pre-folded into w; only the shift remains in the epilogue.
    y = jnp.dot(x_ref[...], w_ref[...], preferred_element_type=jnp.float32)
    y = y + b_ref[...]
    if relu_out:
        y = jnp.maximum(y, 0.0)
    o_ref[...] = y.astype(o_ref.dtype)


def _mm_res_kernel(x_ref, w_ref, b_ref, r_ref, o_ref, *, relu_out):
    y = jnp.dot(x_ref[...], w_ref[...], preferred_element_type=jnp.float32)
    y = y + b_ref[...] + r_ref[...].astype(jnp.float32)
    if relu_out:
        y = jnp.maximum(y, 0.0)
    o_ref[...] = y.astype(o_ref.dtype)


def _conv3x3_kernel(a_ref, b_ref, w_ref, s_ref, o_ref, *, shifts, tm, relu_out):
    """Fused stride-1 3x3 (optionally dilated) conv tile.

    a_ref/b_ref are blocks i and i+1 of the flattened, spatially padded
    activation (same HBM buffer, two block views -> a 2*TM halo window).
    The 9 kernel taps are static row shifts inside that window; each tap is a
    (TM, C) x (C, TN) MXU matmul accumulated in f32.
    """
    window = jnp.concatenate([a_ref[...], b_ref[...]], axis=0)    # (2*TM, C)
    acc = None
    for kk, sh in enumerate(shifts):
        xs = window[sh:sh + tm, :]                                # static slice
        part = jnp.dot(xs, w_ref[kk], preferred_element_type=jnp.float32)
        acc = part if acc is None else acc + part
    y = acc + s_ref[...]
    if relu_out:
        y = jnp.maximum(y, 0.0)
    o_ref[...] = y.astype(o_ref.dtype)


# ----------------------------------------------------------------------------
# Tiled matmul wrapper (1x1 convs and im2col convs)
# ----------------------------------------------------------------------------
def matmul_bn(x, w, shift, residual=None, *, relu_out=False):
    """(M,K) @ (K,N) on the MXU with fused shift / residual / ReLU epilogue."""
    M, K = x.shape
    _, Nc = w.shape
    x = x.astype(jnp.bfloat16)
    w = w.astype(jnp.bfloat16)

    TM = 256 if M >= 256 else _round_up(M, 8)
    if M <= 64 and Nc % 512 == 0:
        TN = 512          # few, larger N tiles for the tiny-M late layers
    elif Nc % 256 == 0:
        TN = 256
    elif Nc % 128 == 0:
        TN = 128
    else:
        TN = Nc

    Mp = _round_up(M, TM)
    if Mp != M:
        x = jnp.pad(x, ((0, Mp - M), (0, 0)))
    mt, nt = Mp // TM, Nc // TN
    shift2 = shift.reshape(1, Nc).astype(jnp.float32)

    # Grid order: activation-stationary (N fast) vs weight-stationary (M fast),
    # chosen by which direction re-fetches fewer elements from HBM.
    n_fast = Mp * K + mt * K * Nc        # x once per M-tile, w every step
    m_fast = nt * Mp * K + K * Nc        # w once per N-tile, x every step
    wstat = m_fast < n_fast
    if wstat:
        grid = (nt, mt)
        ix = lambda j, i: (i, 0)
        iw = lambda j, i: (0, j)
        ib = lambda j, i: (0, j)
        io = lambda j, i: (i, j)
    else:
        grid = (mt, nt)
        ix = lambda i, j: (i, 0)
        iw = lambda i, j: (0, j)
        ib = lambda i, j: (0, j)
        io = lambda i, j: (i, j)

    x_spec = pl.BlockSpec((TM, K), ix)
    w_spec = pl.BlockSpec((K, TN), iw)
    b_spec = pl.BlockSpec((1, TN), ib)
    o_spec = pl.BlockSpec((TM, TN), io)
    out_shape = jax.ShapeDtypeStruct((Mp, Nc), jnp.bfloat16)

    if residual is None:
        kern = functools.partial(_mm_kernel, relu_out=relu_out)
        in_specs = [x_spec, w_spec, b_spec]
        args = (x, w, shift2)
    else:
        r = residual.astype(jnp.bfloat16)
        if Mp != M:
            r = jnp.pad(r, ((0, Mp - M), (0, 0)))
        kern = functools.partial(_mm_res_kernel, relu_out=relu_out)
        in_specs = [x_spec, w_spec, b_spec, o_spec]
        args = (x, w, shift2, r)

    y = pl.pallas_call(
        kern,
        grid=grid,
        in_specs=in_specs,
        out_specs=o_spec,
        out_shape=out_shape,
        compiler_params=_MM_PARAMS,
    )(*args)
    return y[:M] if Mp != M else y


# ----------------------------------------------------------------------------
# Conv wrappers
# ----------------------------------------------------------------------------
@functools.partial(jax.jit, static_argnames=("stride", "relu_out"))
def conv1x1_bn(x, w, shift, residual=None, *, stride=1, relu_out=False):
    """1x1 conv + folded BN (+ residual + ReLU). Stride applied BEFORE compute."""
    if stride > 1:
        x = x[:, ::stride, ::stride, :]
    N, H, W, C = x.shape
    Cout = w.shape[1]
    r = None if residual is None else residual.reshape(N * H * W, Cout)
    y = matmul_bn(x.reshape(N * H * W, C), w, shift, r, relu_out=relu_out)
    return y.reshape(N, H, W, Cout)


@functools.partial(jax.jit, static_argnames=("k", "stride", "pad", "dil", "relu_out"))
def conv_im2col_bn(x, w_mat, shift, *, k, stride, pad, dil=1, relu_out=False):
    """kxk conv via strided bf16 im2col + tiled Pallas matmul (stem / stride-2)."""
    x = x.astype(jnp.bfloat16)
    N, H, W, C = x.shape
    xp = jnp.pad(x, ((0, 0), (pad, pad), (pad, pad), (0, 0)))
    Ho = (H + 2 * pad - dil * (k - 1) - 1) // stride + 1
    Wo = (W + 2 * pad - dil * (k - 1) - 1) // stride + 1
    cols = []
    # K ordering is (kh, kw, Cin) -- matches the weight reshape in ParamGen.
    for kh in range(k):
        for kw in range(k):
            cols.append(
                xp[:, kh * dil:kh * dil + (Ho - 1) * stride + 1:stride,
                      kw * dil:kw * dil + (Wo - 1) * stride + 1:stride, :])
    cols = jnp.concatenate(cols, axis=-1)                  # (N,Ho,Wo,k*k*C) bf16
    y = matmul_bn(cols.reshape(N * Ho * Wo, k * k * C), w_mat, shift,
                  relu_out=relu_out)
    return y.reshape(N, Ho, Wo, w_mat.shape[1])


@functools.partial(jax.jit, static_argnames=("dil", "relu_out"))
def conv3x3_fused(x, w_kk, shift, *, dil=1, relu_out=True):
    """Fused stride-1 3x3 conv (dilation supported): no im2col HBM round trip.

    The spatially padded activation is flattened to (N*Hp*Wp, C); output row m
    equals sum_kk flat[m + shift_kk] @ W[kk].  Valid rows are sliced out after
    the kernel (the Hp*Wp/H*W over-compute is the price for zero gather glue).
    """
    N, H, W, C = x.shape
    KK, _, Cout = w_kk.shape
    k, p = 3, dil
    Hp, Wp = H + 2 * p, W + 2 * p
    M = N * Hp * Wp
    TM = 256 if M >= 256 else _round_up(M, 8)
    shifts = tuple(kh * dil * Wp + kw * dil for kh in range(k) for kw in range(k))
    if max(shifts) >= TM:
        # TODO(synk): very wide rows exceed the two-block halo window; fall back.
        return conv_im2col_bn(x, w_kk.reshape(KK * C, Cout), shift,
                              k=3, stride=1, pad=p, dil=dil, relu_out=relu_out)

    mt = pl.cdiv(M, TM)
    Mp = mt * TM
    F = Mp + TM                                      # one extra block for the halo
    xf = jnp.pad(x.astype(jnp.bfloat16),
                 ((0, 0), (p, p), (p, p), (0, 0))).reshape(M, C)
    xf = jnp.pad(xf, ((0, F - M), (0, 0)))

    if Cout % 256 == 0:
        TN = 256
    elif Cout % 128 == 0:
        TN = 128
    else:
        TN = Cout
    nt = Cout // TN
    shift2 = shift.reshape(1, Cout).astype(jnp.float32)

    # Grid order choice (x is read twice per M tile via the two halo inputs).
    n_fast = 2 * Mp * C + mt * KK * C * Cout
    m_fast = nt * 2 * Mp * C + KK * C * Cout
    wstat = m_fast < n_fast
    if wstat:
        grid = (nt, mt)
        ia = lambda j, i: (i, 0)
        ib = lambda j, i: (i + 1, 0)
        iw = lambda j, i: (0, 0, j)
        isf = lambda j, i: (0, j)
        io = lambda j, i: (i, j)
    else:
        grid = (mt, nt)
        ia = lambda i, j: (i, 0)
        ib = lambda i, j: (i + 1, 0)
        iw = lambda i, j: (0, 0, j)
        isf = lambda i, j: (0, j)
        io = lambda i, j: (i, j)

    kern = functools.partial(_conv3x3_kernel, shifts=shifts, tm=TM,
                             relu_out=relu_out)
    y = pl.pallas_call(
        kern,
        grid=grid,
        in_specs=[pl.BlockSpec((TM, C), ia),
                  pl.BlockSpec((TM, C), ib),
                  pl.BlockSpec((KK, C, TN), iw),
                  pl.BlockSpec((1, TN), isf)],
        out_specs=pl.BlockSpec((TM, TN), io),
        out_shape=jax.ShapeDtypeStruct((Mp, Cout), jnp.bfloat16),
        compiler_params=_MM_PARAMS,
    )(xf, xf, w_kk, shift2)
    return y[:M].reshape(N, Hp, Wp, Cout)[:, :H, :W, :]


def maxpool_3x3_s2(x):
    # TODO(synk): max-pool left to XLA reduce_window (single small op).
    return lax.reduce_window(
        x, jnp.array(-jnp.inf, x.dtype), lax.max,
        window_dimensions=(1, 3, 3, 1), window_strides=(1, 2, 2, 1),
        padding=((0, 0), (1, 1), (1, 1), (0, 0)))


# ----------------------------------------------------------------------------
# Deterministic parameter construction (replaces pretrained model_zoo weights)
# ----------------------------------------------------------------------------
class ParamGen:
    def __init__(self, seed=0):
        self.key = jax.random.PRNGKey(seed)

    def _next(self):
        self.key, sub = jax.random.split(self.key)
        return sub

    def conv_bn(self, cin, cout, k=1, cin_pad=None, cout_pad=None, stacked=False):
        """He-init conv weight with eval-mode BN scale folded into the columns.

        Returns (w, shift): w is (k*k*cin_pad, cout_pad) bf16, or
        (k*k, cin_pad, cout_pad) if stacked=True (layout for the fused 3x3
        kernel).  Padded channel rows/cols are zero so padded lanes stay zero.
        K ordering is (kh, kw, cin).
        """
        cin_pad = cin if cin_pad is None else cin_pad
        cout_pad = cout if cout_pad is None else cout_pad
        fan_in = k * k * cin
        w = jax.random.normal(self._next(), (k, k, cin, cout), jnp.float32)
        w = w * math.sqrt(2.0 / fan_in)
        # Eval-mode BN with fresh running stats.
        gamma = jnp.ones((cout,), jnp.float32)
        beta = jnp.zeros((cout,), jnp.float32)
        mean = jnp.zeros((cout,), jnp.float32)
        var = jnp.ones((cout,), jnp.float32)
        scale = gamma * lax.rsqrt(var + BN_EPS)
        shift = beta - mean * scale
        w = w * scale[None, None, None, :]                   # fold BN scale
        wp = jnp.zeros((k, k, cin_pad, cout_pad), jnp.float32)
        wp = wp.at[:, :, :cin, :cout].set(w)
        sp = jnp.zeros((cout_pad,), jnp.float32).at[:cout].set(shift)
        if stacked:
            wm = wp.reshape(k * k, cin_pad, cout_pad)
        else:
            wm = wp.reshape(k * k * cin_pad, cout_pad)
        return wm.astype(jnp.bfloat16), sp.reshape(1, cout_pad)


def make_bottleneck(pg, inplanes, planes, stride, dil, downsample):
    cin_p, mid_p, cout = _apad(inplanes), _apad(planes), planes * 4
    w1, s1 = pg.conv_bn(inplanes, planes, k=1, cin_pad=cin_p, cout_pad=mid_p)
    w2, s2 = pg.conv_bn(planes, planes, k=3, cin_pad=mid_p, cout_pad=mid_p,
                        stacked=(stride == 1))
    w3, s3 = pg.conv_bn(planes, cout, k=1, cin_pad=mid_p, cout_pad=cout)
    bp = {'w1': w1, 's1': s1, 'w2': w2, 's2': s2, 'w3': w3, 's3': s3,
          'cfg': dict(stride=stride, dil=dil)}
    if downsample:
        bp['ds_w'], bp['ds_s'] = pg.conv_bn(inplanes, cout, k=1,
                                            cin_pad=cin_p, cout_pad=cout)
    else:
        bp['ds_w'], bp['ds_s'] = None, None
    return bp


def make_layer(pg, inplanes, planes, blocks, stride, dil):
    layer = []
    for b in range(blocks):
        s = stride if b == 0 else 1
        ds = (b == 0) and (stride != 1 or inplanes != planes * 4)
        layer.append(make_bottleneck(pg, inplanes if b == 0 else planes * 4,
                                     planes, s, dil, ds))
    return layer


def make_resnet_params(pg, in_channels=3, output_stride=16, layers=(3, 4, 23, 3)):
    """torchvision resnet101-style backbone with DeepLabV3+ output_stride surgery."""
    if output_stride == 16:
        s3, s4, d3, d4 = 2, 1, 1, 2
    elif output_stride == 8:
        s3, s4, d3, d4 = 1, 1, 2, 4
    else:
        raise ValueError(output_stride)
    p = {}
    p['conv1_w'], p['conv1_s'] = pg.conv_bn(in_channels, 64, k=7, cout_pad=128)
    p['layer1'] = make_layer(pg, 64, 64, layers[0], stride=1, dil=1)
    p['layer2'] = make_layer(pg, 256, 128, layers[1], stride=2, dil=1)
    p['layer3'] = make_layer(pg, 512, 256, layers[2], stride=s3, dil=d3)
    p['layer4'] = make_layer(pg, 1024, 512, layers[3], stride=s4, dil=d4)
    return p


# ----------------------------------------------------------------------------
# Forward pass (mirrors ResNet.forward: layer0..layer4, low-level = layer1 out)
# ----------------------------------------------------------------------------
def bottleneck_forward(x, bp):
    stride = bp['cfg']['stride']
    dil = bp['cfg']['dil']
    if bp['ds_w'] is not None:
        identity = conv1x1_bn(x, bp['ds_w'], bp['ds_s'],
                              stride=stride, relu_out=False)
    else:
        identity = x
    h = conv1x1_bn(x, bp['w1'], bp['s1'], relu_out=True)
    if stride == 1:
        h = conv3x3_fused(h, bp['w2'], bp['s2'], dil=dil, relu_out=True)
    else:
        h = conv_im2col_bn(h, bp['w2'], bp['s2'], k=3, stride=stride,
                           pad=dil, dil=dil, relu_out=True)
    h = conv1x1_bn(h, bp['w3'], bp['s3'], residual=identity, relu_out=True)
    return h


def resnet_forward(x_nchw, p):
    x = jnp.transpose(x_nchw, (0, 2, 3, 1)).astype(jnp.bfloat16)   # NCHW -> NHWC
    # layer0: conv7x7 s2 + BN + ReLU + maxpool3x3 s2
    x = conv_im2col_bn(x, p['conv1_w'], p['conv1_s'],
                       k=7, stride=2, pad=3, dil=1, relu_out=True)
    x = maxpool_3x3_s2(x)
    for blk in p['layer1']:
        x = bottleneck_forward(x, blk)
    low = x                                                        # low-level feats
    for blk in p['layer2']:
        x = bottleneck_forward(x, blk)
    for blk in p['layer3']:
        x = bottleneck_forward(x, blk)
    for blk in p['layer4']:
        x = bottleneck_forward(x, blk)
    out = jnp.transpose(x, (0, 3, 1, 2)).astype(jnp.float32)       # NHWC -> NCHW
    low = jnp.transpose(low, (0, 3, 1, 2)).astype(jnp.float32)
    return out, low


if __name__ == "__main__":
    key = jax.random.PRNGKey(0)
    # Small PyTorch-style NCHW input: batch=2, in_channels=3, 64x64
    x_nchw = jax.random.normal(key, (2, 3, 64, 64), jnp.float32)

    pg = ParamGen(0)
    params = make_resnet_params(pg, in_channels=3, output_stride=16,
                                layers=(3, 4, 23, 3))   # resnet101

    out, low = resnet_forward(x_nchw, params)
    out = jax.block_until_ready(out)
    low = jax.block_until_ready(low)

    # output_stride=16: 64 -> 4 spatial, 2048 channels; low-level: 16x16, 256 ch
    assert out.shape == (2, 2048, 4, 4), out.shape
    assert low.shape == (2, 256, 16, 16), low.shape
    assert bool(jnp.all(jnp.isfinite(out))) and bool(jnp.all(jnp.isfinite(low)))
    print("KERNEL_OK")
</pallas_src>

<mosaic_0001>
module attributes {stable_mosaic.version = 11 : i64} {
  func.func @_mm_kernel(%arg0: i32, %arg1: i32, %arg2: memref<256x147xbf16, #tpu.memory_space<vmem>>, %arg3: memref<147x128xbf16, #tpu.memory_space<vmem>>, %arg4: memref<1x128xf32, #tpu.memory_space<vmem>>, %arg5: memref<256x128xbf16, #tpu.memory_space<vmem>>) attributes {dimension_semantics = [#tpu.dimension_semantics<parallel>, #tpu.dimension_semantics<parallel>], iteration_bounds = array<i64: 1, 8>, scalar_prefetch = 0 : i64, scratch_operands = 0 : i64, tpu.core_type = #tpu.core_type<tc>, window_params = [{transform_indices = @transform_0, window_bounds = array<i64: 256, 147>}, {transform_indices = @transform_1, window_bounds = array<i64: 147, 128>}, {transform_indices = @transform_2, window_bounds = array<i64: 1, 128>}, {transform_indices = @transform_3, window_bounds = array<i64: 256, 128>}]} {
    %c0 = arith.constant 0 : index
    %c0_0 = arith.constant 0 : index
    %0 = vector.load %arg2[%c0, %c0_0] : memref<256x147xbf16, #tpu.memory_space<vmem>>, vector<256x147xbf16>
    %c0_1 = arith.constant 0 : index
    %c0_2 = arith.constant 0 : index
    %1 = vector.load %arg3[%c0_1, %c0_2] : memref<147x128xbf16, #tpu.memory_space<vmem>>, vector<147x128xbf16>
    %cst = arith.constant dense<0.000000e+00> : vector<256x128xf32>
    %2 = tpu.matmul %0, %1, %cst {dimension_numbers = #tpu.dot_dimension_numbers<[1], [0], [0], [1], [0, 0, 1, 1], [], []>} : vector<256x147xbf16>, vector<147x128xbf16>, vector<256x128xf32> -> vector<256x128xf32>
    %c0_3 = arith.constant 0 : index
    %c0_4 = arith.constant 0 : index
    %3 = vector.load %arg4[%c0_3, %c0_4] : memref<1x128xf32, #tpu.memory_space<vmem>>, vector<1x128xf32>
    %4 = vector.broadcast %3 : vector<1x128xf32> to vector<256x128xf32>
    %5 = arith.addf %2, %4 : vector<256x128xf32>
    %cst_5 = arith.constant 0.000000e+00 : f32
    %6 = vector.broadcast %cst_5 : f32 to vector<256x128xf32>
    %7 = arith.maximumf %5, %6 : vector<256x128xf32>
    %8 = arith.truncf %7 : vector<256x128xf32> to vector<256x128xbf16>
    %c0_6 = arith.constant 0 : index
    %c0_7 = arith.constant 0 : index
    %9 = vector.load %arg5[%c0_6, %c0_7] : memref<256x128xbf16, #tpu.memory_space<vmem>>, vector<256x128xbf16>
    tpu.vector_store %arg5[%c0_6, %c0_7], %8 {strides = array<i32>} : memref<256x128xbf16, #tpu.memory_space<vmem>>, vector<256x128xbf16>,
    return
  }
  func.func @transform_0(%arg0: i32, %arg1: i32) -> (i32, i32) {
    %c0_i32 = arith.constant 0 : i32
    %c0_i32_0 = arith.constant 0 : i32
    return %arg1, %c0_i32 : i32, i32
  }
  func.func @transform_1(%arg0: i32, %arg1: i32) -> (i32, i32) {
    %c0_i32 = arith.constant 0 : i32
    %c0_i32_0 = arith.constant 0 : i32
    return %c0_i32, %arg0 : i32, i32
  }
  func.func @transform_2(%arg0: i32, %arg1: i32) -> (i32, i32) {
    %c0_i32 = arith.constant 0 : i32
    %c0_i32_0 = arith.constant 0 : i32
    return %c0_i32, %arg0 : i32, i32
  }
  func.func @transform_3(%arg0: i32, %arg1: i32) -> (i32, i32) {
    %c0_i32 = arith.constant 0 : i32
    return %arg1, %arg0 : i32, i32
  }
}

</mosaic_0001>

<bundles_post_ra>
// kernel: conv_im2col_bn.1
= control target key start
LH: loop header
LB: loop body
LE: loop exit
PB: predicated region body
PF: predicated region fallthrough
CT: control target
= control target key end

     0   :  { %8 = vsyncpa [#allocation3], 0  ;;  %s1735_s0 = inlined_call_operand.vmem [shape: bf16[2048,147], index: 0, kind: input, shape index: {}]   ;;  %s1736_s1 = inlined_call_operand.vmem [shape: bf16[147,128], index: 1, kind: input, shape index: {}]   ;;  %s1737_s2 = inlined_call_operand.vmem [shape: f32[1,128], index: 2, kind: input, shape index: {}]   ;;  %s1738_s3 = inlined_call_operand.hbm [shape: bf16[2048,128], index: 3, kind: output, shape index: {}]  }
   0x1   :  { %10 = vsyncpa [#allocation3 + $0x1], 0  ;;  %s1481_s12 = smov 0   ;;  %s1483_s13 = smov 0  }
   0x2   :  { %s1485_s14 = smov 0   ;;  %s1487_s15 = smov 0  }
   0x3   :  { %s1489_s16 = smov 0   ;;  %s1491_s17 = smov 0  }
   0x4 LB: > { %s1003_s18 = sadd.s32 4294967295, %s1454_s17   ;;  %s1004_s19 = sadd.s32 4294967294, %s1454_s17   ;;  %s1454_s17 = sphi %s1491_s17, %s16_s17   ;;  %s1450_s16 = sphi %s1489_s16, %s1745_s16   ;;  %s1446_s15 = sphi %s1487_s15, %s1744_s15   ;;  %s1442_s14 = sphi %s1485_s14, %s1743_s14   ;;  %s1438_s13 = sphi %s1483_s13, %s1742_s13   ;;  %s1434_s12 = sphi %s1481_s12, %s1741_s12  }
   0x5   : > { %s25_s20 = sadd.s32 1, %s1450_s16  ;;  %s115_s21 = sadd.s32 1, %s1442_s14 }
   0x6   : > { %p26_p0 = scmp.ge.s32.totalorder %s25_s20, 8  ;;  %p125_p1 = scmp.ne.s32.totalorder %s1442_s14, %s1438_s13 }
   0x7   : > { %p126_p2 = scmp.eq.s32.totalorder %s1003_s18, 7  ;;  %p131_p3 = scmp.ne.s32.totalorder %s1438_s13, %s1434_s12 }
   0x8   : > { %s1747_s20 = smov (%p26_p0, %s25_s20), 0  ;;  %p132_p5 = scmp.eq.s32.totalorder %s1004_s19, 7 }
   0x9   : > { %p1521_p4 = por %p126_p2, %p125_p1  ;;  %s110_s23 = ssub.s32 %s1450_s16, %s1747_s20 }
   0xa   : > { %p1009_p6 = scmp.ge.s32.totalorder %s1454_s17, 1  ;;  %p113_p7 = scmp.eq.s32.totalorder %s110_s23, 0 }
   0xb   : > { %p1528_p8 = por %p132_p5, %p131_p3  ;;  %p173_p9 = scmp.lt.s32.totalorder %s1454_s17, 9 }
   0xc   : > { %s1534_s25 = scalar_select %p113_p7, %s1442_s14, %s115_s21  }
   0xd   : > { %p174_p10 = pnand %p1009_p6, %p173_p9 }
   0xe   : > { %v1318_v0 = vld [vmem:[%s1736_s1] sm:$0xff] (!%p174_p10)   ;;  %v1456_v1 = vmov (!%p174_p10), 0   ;;  %v1319_v2 = vld [vmem:[%s1736_s1 + $0x8] sm:$0xff] (!%p174_p10)   ;;  %v1320_v3 = vld [vmem:[%s1736_s1 + $0x10] sm:$0xff] (!%p174_p10)   ;;  %s1011_s5 = sshll.u32 (!%p174_p10), %s1446_s15, 5  ;;  %vm480_vm0 = vcmask (!%p174_p10), 154624  }
   0xf   : > { %177 = sbr.rel (%p174_p10) target bundleno = 346 (0x15a), region = 32  ;;  %536 = vmatprep.subr.bf16.mxu0 (!%p174_p10), %v1456_v1  ;;  %1239 = vmatprep.subr.bf16.mxu1 (!%p174_p10), %v1456_v1  ;;  %p206_p11 = scmp.lt.s32.totalorder (!%p174_p10), %s1011_s5, 255  ;;  %v1321_v4 = vld [vmem:[%s1736_s1 + $0x18] sm:$0xff] (!%p174_p10)   ;;  %v1322_v5 = vld [vmem:[%s1736_s1 + $0x20] sm:$0xff] (!%p174_p10)   ;;  %v1323_v8 = vld [vmem:[%s1736_s1 + $0x28] sm:$0xff] (!%p174_p10)   ;;  %vm529_vm1 = vcmask (!%p174_p10), 1040384  }
  0x10   : > { %537 = vmatpush1.bf16.msra.mxu0 (!%p174_p10), %v1318_v0  ;;  %1249 = vmatpush1.bf16.msra.mxu1 (!%p174_p10), %v1318_v0  ;;  %v1324_v9 = vld [vmem:[%s1736_s1 + $0x30] sm:$0xff] (!%p174_p10)   ;;  %v1325_v10 = vld [vmem:[%s1736_s1 + $0x38] sm:$0xff] (!%p174_p10)   ;;  %vm530_vm2 = vcmask (!%p174_p10), 1041408   ;;  %v1457_v11 = vmov (!%p174_p10), 65535   ;;  %v1326_v13 = vld [vmem:[%s1736_s1 + $0x40] sm:$0xff] (!%p174_p10)   ;;  %s202_s9 = sand.u32 (!%p174_p10), 1, %s1438_s13  }
  0x11   : > { %538 = vmatprep.subr.bf16.mxu0 (!%p174_p10), %v1456_v1  ;;  %1240 = vmatprep.subr.bf16.mxu1 (!%p174_p10), %v1456_v1  ;;  %v531_v12 = vsel (!%p174_p10), %vm529_vm1, 4294967295, %v1457_v11  ;;  %v1327_v14 = vld [vmem:[%s1736_s1 + $0x48] ss:$0 sps:$4 sm:$0x33] (!%p174_p10)   ;;  %v1623_v47 = vld [vmem:[%s1737_s2] ss:$0 sm:$0xff] (!%p174_p10) }
  0x12   : > { %v532_v15 = vsel (!%p174_p10), %vm530_vm2, %v531_v12, 0  ;;  %s1010_s10 = sshll.u32 (!%p174_p10), %s202_s9, 7  ;;  %s1143_s18 = sshll.u32 (!%p174_p10), %s1446_s15, 11 }
  0x13   : > { %v534_v16 = vand.u32 (!%p174_p10), %v1327_v14, %v532_v15  ;;  %s1681_s26 = scalar_lea.hbm (!%p174_p10), %s1738_s3, %s1143_s18  ;;  %s1689_s15 = scalar_lea.sflag (!%p174_p10), [#allocation3], %s202_s9 }
  0x14   : > { %539 = vmatpush1.bf16.msra.mxu0 (!%p174_p10), %v1319_v2  ;;  %1250 = vmatpush1.bf16.msra.mxu1 (!%p174_p10), %v1319_v2  ;;  %s1458_s28 = smov (!%p174_p10), [#allocation2]  }
  0x15   : > { %540 = vmatprep.subr.bf16.mxu0 (!%p174_p10), %v1456_v1  ;;  %1241 = vmatprep.subr.bf16.mxu1 (!%p174_p10), %v1456_v1  ;;  %s1380_s29 = sshll.u32 (!%p174_p10), %s1458_s28, 4  ;;  %s1381_s29 = int_to_ptr.vmem [resolvable:$false] %s1380_s29 }
  0x16   : > { %s1749_s5 = smov (!%p206_p11, %s1011_s5), 255  ;;  %s1382_s30 = scalar_lea.vmem %s1381_s29, 4096 }
  0x17   : > { %s1110_s8 = sshll.u32 %s1749_s5, 3 }
  0x18   : > { %541 = vmatpush1.bf16.msra.mxu0 %v1320_v3  ;;  %1251 = vmatpush1.bf16.msra.mxu1 %v1320_v3  ;;  %s1552_s11 = scalar_lea.vmem %s1735_s0, %s1110_s8 }
  0x19   : > { %542 = vmatprep.subr.bf16.mxu0 %v1456_v1  ;;  %1242 = vmatprep.subr.bf16.mxu1 %v1456_v1  ;;  %v1330_v6 = vld [vmem:[%s1552_s11 + $0x4] ss:$8 sps:$4 sm:$0xff]   ;;  %v1328_v17 = vld [vmem:[%s1552_s11] ss:$8 sps:$4 sm:$0xff]   ;;  %v1334_v19 = vld [vmem:[%s1552_s11 + $0x14] ss:$8 sps:$4 sm:$0xff]  }
  0x1a   : > { %v1333_v7 = vld [vmem:[%s1552_s11 + $0x84] ss:$8 sps:$4 sm:$0xff]   ;;  %1057 = vmatprep.mubr.msk.bf16.mxu0 %vm480_vm0, %v1330_v6  ;;  %v1331_v18 = vld [vmem:[%s1552_s11 + $0x80] ss:$8 sps:$4 sm:$0xff]   ;;  %v1336_v20 = vld [vmem:[%s1552_s11 + $0x94] ss:$8 sps:$4 sm:$0xff]  }
  0x1b   : > { %1065 = vmatprep.mubr.msk.bf16.mxu1 %vm480_vm0, %v1333_v7  ;;  %v1338_v21 = vld [vmem:[%s1552_s11 + $0x10] ss:$8 sps:$4 sm:$0xff]   ;;  %v1340_v23 = vld [vmem:[%s1552_s11 + $0x24] ss:$8 sps:$4 sm:$0xff]   ;;  %v1344_v25 = vld [vmem:[%s1552_s11 + $0x20] ss:$8 sps:$4 sm:$0xff]  }
  0x1c   : > { %543 = vmatpush1.bf16.msra.mxu0 %v1321_v4  ;;  %1252 = vmatpush1.bf16.msra.mxu1 %v1321_v4  ;;  %v1339_v22 = vld [vmem:[%s1552_s11 + $0x90] ss:$8 sps:$4 sm:$0xff]   ;;  %v1342_v24 = vld [vmem:[%s1552_s11 + $0xa4] ss:$8 sps:$4 sm:$0xff]   ;;  %v1345_v26 = vld [vmem:[%s1552_s11 + $0xa0] ss:$8 sps:$4 sm:$0xff]  }
  0x1d   : > { %544 = vmatprep.subr.bf16.mxu0 %v1456_v1  ;;  %1243 = vmatprep.subr.bf16.mxu1 %v1456_v1  ;;  %v1346_v27 = vld [vmem:[%s1552_s11 + $0x34] ss:$8 sps:$4 sm:$0xff]   ;;  %v1350_v29 = vld [vmem:[%s1552_s11 + $0x30] ss:$8 sps:$4 sm:$0xff]   ;;  %v1352_v31 = vld [vmem:[%s1552_s11 + $0x44] ss:$8 sps:$4 sm:$0xff]  }
  0x1e   : > { %v1348_v28 = vld [vmem:[%s1552_s11 + $0xb4] ss:$8 sps:$4 sm:$0xff]   ;;  %v1351_v30 = vld [vmem:[%s1552_s11 + $0xb0] ss:$8 sps:$4 sm:$0xff]   ;;  %v1354_v32 = vld [vmem:[%s1552_s11 + $0xc4] ss:$8 sps:$4 sm:$0xff]  }
  0x1f   : > { %v1356_v33 = vld [vmem:[%s1552_s11 + $0x40] ss:$8 sps:$4 sm:$0xff]   ;;  %v1358_v35 = vld [vmem:[%s1552_s11 + $0x54] ss:$8 sps:$4 sm:$0xff]   ;;  %v1362_v37 = vld [vmem:[%s1552_s11 + $0x50] ss:$8 sps:$4 sm:$0xff]  }
  0x20   : > { %545 = vmatpush1.bf16.msra.mxu0 %v1322_v5  ;;  %1253 = vmatpush1.bf16.msra.mxu1 %v1322_v5  ;;  %v1357_v34 = vld [vmem:[%s1552_s11 + $0xc0] ss:$8 sps:$4 sm:$0xff]   ;;  %v1360_v36 = vld [vmem:[%s1552_s11 + $0xd4] ss:$8 sps:$4 sm:$0xff]   ;;  %v1363_v38 = vld [vmem:[%s1552_s11 + $0xd0] ss:$8 sps:$4 sm:$0xff]  }
  0x21   : > { %546 = vmatprep.subr.bf16.mxu0 %v1456_v1  ;;  %1244 = vmatprep.subr.bf16.mxu1 %v1456_v1  ;;  %v1364_v39 = vld [vmem:[%s1552_s11 + $0x64] ss:$8 sps:$4 sm:$0xff]   ;;  %v1368_v41 = vld [vmem:[%s1552_s11 + $0x60] ss:$8 sps:$4 sm:$0xff]   ;;  %v1370_v43 = vld [vmem:[%s1552_s11 + $0x74] ss:$8 sps:$4 sm:$0xff]  }
  0x22   : > { %v1366_v40 = vld [vmem:[%s1552_s11 + $0xe4] ss:$8 sps:$4 sm:$0xff]   ;;  %v1369_v42 = vld [vmem:[%s1552_s11 + $0xe0] ss:$8 sps:$4 sm:$0xff]   ;;  %v1372_v44 = vld [vmem:[%s1552_s11 + $0xf4] ss:$8 sps:$4 sm:$0xff]  }
  0x23   : > { %v1374_v45 = vld [vmem:[%s1552_s11 + $0x70] ss:$8 sps:$4 sm:$0xff]  }
  0x24   : > { %547 = vmatpush1.bf16.msra.mxu0 %v1323_v8  ;;  %1254 = vmatpush1.bf16.msra.mxu1 %v1323_v8  ;;  %v1375_v46 = vld [vmem:[%s1552_s11 + $0xf0] ss:$8 sps:$4 sm:$0xff]   ;;  %s1632_s11 = scalar_lea.vmem [#allocation2], %s1010_s10 }
  0x25   : > { %548 = vmatprep.subr.bf16.mxu0 %v1456_v1  ;;  %1245 = vmatprep.subr.bf16.mxu1 %v1456_v1  ;;  %s904_s19 = sshll.u32 %s1632_s11, 4  ;;  %s1683_s19 = int_to_ptr.vmem [resolvable:$true] %s904_s19 }
  0x26   : > { %s1376_s27 = scalar_lea.vmem %s1683_s19, 2048  ;;  %p1383_p1 = scmp.lt.s32.totalorder %s1683_s19, %s1381_s29 }
  0x27   : > { %p1377_p12 = scmp.ne.s32.totalorder %s1683_s19, %s1376_s27  ;;  %p1384_p2 = scmp.lt.s32.totalorder %s1382_s30, %s1376_s27 }
  0x28   : > { %549 = vmatpush1.bf16.msra.mxu0 %v1324_v9  ;;  %1255 = vmatpush1.bf16.msra.mxu1 %v1324_v9 }
  0x29   : > { %550 = vmatprep.subr.bf16.mxu0 %v1456_v1  ;;  %1246 = vmatprep.subr.bf16.mxu1 %v1456_v1  ;;  %p1378_p13 = pnand %p1377_p12, %p1521_p4  ;;  %p1385_p3 = por %p1384_p2, %p1383_p1 }
  0x2b   : > { %p1379_p0 = pneg %p1378_p13 }
  0x2c   : > { %551 = vmatpush1.bf16.msra.mxu0 %v1325_v10  ;;  %1256 = vmatpush1.bf16.msra.mxu1 %v1325_v10 }
  0x2d   : > { %552 = vmatprep.subr.bf16.mxu0 %v1456_v1  ;;  %1247 = vmatprep.subr.bf16.mxu1 %v1456_v1  ;;  %p1386_p5 = pnand %p1385_p3, %p1379_p0 }
  0x30   : > { %553 = vmatpush1.bf16.msra.mxu0 %v1326_v13  ;;  %1257 = vmatpush1.bf16.msra.mxu1 %v1326_v13 }
  0x31   : > { %554 = vmatprep.subr.bf16.mxu0 %v1456_v1  ;;  %1248 = vmatprep.subr.bf16.mxu1 %v1456_v1 }
  0x34   : > { %555 = vmatpush1.bf16.msra.mxu0 %v534_v16  ;;  %1258 = vmatpush1.bf16.msra.mxu1 %v534_v16 }
  0x37   : > { %569 = vmatmul.mubr.bf16.vlgmr.msra.gmra.mrb[0].mxu0 %v1328_v17  ;;  %633 = vmatmul.mubr.bf16.vlgmr.msra.gmra.mrb[0].mxu1 %v1331_v18 }
  0x38   : > { %1058 = vmatprep.mubr.msk.bf16.mxu0 %vm480_vm0, %v1334_v19  ;;  %1066 = vmatprep.mubr.msk.bf16.mxu1 %vm480_vm0, %v1336_v20 }
  0x3f   : > { %577 = vmatmul.mubr.bf16.gmra.mrb[4].mxu0 %v1338_v21  ;;  %641 = vmatmul.mubr.bf16.gmra.mrb[4].mxu1 %v1339_v22 }
  0x40   : > { %1059 = vmatprep.mubr.msk.bf16.mxu0 %vm480_vm0, %v1340_v23  ;;  %1067 = vmatprep.mubr.msk.bf16.mxu1 %vm480_vm0, %v1342_v24 }
  0x47   : > { %585 = vmatmul.mubr.bf16.gmra.mrb[8].mxu0 %v1344_v25  ;;  %649 = vmatmul.mubr.bf16.gmra.mrb[8].mxu1 %v1345_v26 }
  0x48   : > { %1060 = vmatprep.mubr.msk.bf16.mxu0 %vm480_vm0, %v1346_v27  ;;  %1068 = vmatprep.mubr.msk.bf16.mxu1 %vm480_vm0, %v1348_v28 }
  0x4f   : > { %593 = vmatmul.mubr.bf16.gmra.mrb[12].mxu0 %v1350_v29  ;;  %657 = vmatmul.mubr.bf16.gmra.mrb[12].mxu1 %v1351_v30 }
  0x50   : > { %1061 = vmatprep.mubr.msk.bf16.mxu0 %vm480_vm0, %v1352_v31  ;;  %1069 = vmatprep.mubr.msk.bf16.mxu1 %vm480_vm0, %v1354_v32 }
  0x57   : > { %601 = vmatmul.mubr.bf16.gmra.mrb[16].mxu0 %v1356_v33  ;;  %665 = vmatmul.mubr.bf16.gmra.mrb[16].mxu1 %v1357_v34 }
  0x58   : > { %1062 = vmatprep.mubr.msk.bf16.mxu0 %vm480_vm0, %v1358_v35  ;;  %1070 = vmatprep.mubr.msk.bf16.mxu1 %vm480_vm0, %v1360_v36 }
  0x5f   : > { %609 = vmatmul.mubr.bf16.gmra.mrb[20].mxu0 %v1362_v37  ;;  %673 = vmatmul.mubr.bf16.gmra.mrb[20].mxu1 %v1363_v38 }
  0x60   : > { %1063 = vmatprep.mubr.msk.bf16.mxu0 %vm480_vm0, %v1364_v39  ;;  %1071 = vmatprep.mubr.msk.bf16.mxu1 %vm480_vm0, %v1366_v40 }
  0x67   : > { %617 = vmatmul.mubr.bf16.gmra.mrb[24].mxu0 %v1368_v41  ;;  %681 = vmatmul.mubr.bf16.gmra.mrb[24].mxu1 %v1369_v42 }
  0x68   : > { %1064 = vmatprep.mubr.msk.bf16.mxu0 %vm480_vm0, %v1370_v43  ;;  %1072 = vmatprep.mubr.msk.bf16.mxu1 %vm480_vm0, %v1372_v44 }
  0x6f   : > { %625 = vmatmul.mubr.bf16.gmra.mrb[28].mxu0 %v1374_v45  ;;  %689 = vmatmul.mubr.bf16.gmra.mrb[28].mxu1 %v1375_v46 }
 0x10a   : > { %v570_v48 = vpop.f32.mrb[0].mxu0  ;;  %v634_v49 = vpop.f32.mrb[0].mxu1 }
 0x10b   : > { %v571_v50 = vadd.f32 %v1623_v47, %v570_v48  ;;  %v635_v51 = vadd.f32 %v1623_v47, %v634_v49  ;;  %v572_v52 = vpop.f32.mrb[1].mxu0  ;;  %v636_v53 = vpop.f32.mrb[1].mxu1 }
 0x10c   : > { %v573_v54 = vpop.f32.mrb[2].mxu0  ;;  %v637_v55 = vpop.f32.mrb[2].mxu1 }
 0x10d   : > { %v574_v56 = vadd.f32 %v1623_v47, %v573_v54  ;;  %v638_v57 = vadd.f32 %v1623_v47, %v637_v55  ;;  %v575_v58 = vpop.f32.mrb[3].mxu0  ;;  %v639_v59 = vpop.f32.mrb[3].mxu1  ;;  %v697_v60 = vmax.f32 %v571_v50, 0.0  ;;  %v713_v61 = vmax.f32 %v635_v51, 0.0 }
 0x10f   : > { %v698_v62 = vmax.f32 %v574_v56, 0.0  ;;  %v714_v63 = vmax.f32 %v638_v57, 0.0 }
 0x111   : > { %v1147_v0 = vpack.c.bf16 %v698_v62, %v697_v60  ;;  %v1187_v1 = vpack.c.bf16 %v714_v63, %v713_v61 }
 0x112   : > { %v578_v2 = vpop.f32.mrb[4].mxu0  ;;  %v642_v3 = vpop.f32.mrb[4].mxu1 }
 0x113   : > { %1148 = vst [vmem:[%s1632_s11] sm:$0xff] %v1147_v0   ;;  %1231 = vst [vmem:[%s1632_s11 + $0x40] sm:$0xff] %v1187_v1   ;;  %v579_v4 = vadd.f32 %v1623_v47, %v578_v2  ;;  %v643_v5 = vadd.f32 %v1623_v47, %v642_v3  ;;  %v580_v6 = vpop.f32.mrb[5].mxu0  ;;  %v644_v7 = vpop.f32.mrb[5].mxu1 }
 0x114   : > { %v581_v8 = vpop.f32.mrb[6].mxu0  ;;  %v645_v9 = vpop.f32.mrb[6].mxu1 }
 0x115   : > { %v582_v10 = vadd.f32 %v1623_v47, %v581_v8  ;;  %v646_v11 = vadd.f32 %v1623_v47, %v645_v9  ;;  %v583_v12 = vpop.f32.mrb[7].mxu0  ;;  %v647_v13 = vpop.f32.mrb[7].mxu1  ;;  %v699_v14 = vmax.f32 %v579_v4, 0.0  ;;  %v715_v15 = vmax.f32 %v643_v5, 0.0 }
 0x117   : > { %v700_v16 = vmax.f32 %v582_v10, 0.0  ;;  %v716_v17 = vmax.f32 %v646_v11, 0.0 }
 0x119   : > { %v1152_v18 = vpack.c.bf16 %v700_v16, %v699_v14  ;;  %v1192_v19 = vpack.c.bf16 %v716_v17, %v715_v15 }
 0x11a   : > { %v586_v20 = vpop.f32.mrb[8].mxu0  ;;  %v650_v21 = vpop.f32.mrb[8].mxu1 }
 0x11b   : > { %1224 = vst [vmem:[%s1632_s11 + $0x8] sm:$0xff] %v1152_v18   ;;  %1232 = vst [vmem:[%s1632_s11 + $0x48] sm:$0xff] %v1192_v19   ;;  %v587_v22 = vadd.f32 %v1623_v47, %v586_v20  ;;  %v651_v23 = vadd.f32 %v1623_v47, %v650_v21  ;;  %v588_v24 = vpop.f32.mrb[9].mxu0  ;;  %v652_v25 = vpop.f32.mrb[9].mxu1 }
 0x11c   : > { %v589_v26 = vpop.f32.mrb[10].mxu0  ;;  %v653_v27 = vpop.f32.mrb[10].mxu1 }
 0x11d   : > { %v590_v28 = vadd.f32 %v1623_v47, %v589_v26  ;;  %v654_v29 = vadd.f32 %v1623_v47, %v653_v27  ;;  %v591_v30 = vpop.f32.mrb[11].mxu0  ;;  %v655_v31 = vpop.f32.mrb[11].mxu1  ;;  %v701_v32 = vmax.f32 %v587_v22, 0.0  ;;  %v717_v33 = vmax.f32 %v651_v23, 0.0 }
 0x11f   : > { %v702_v34 = vmax.f32 %v590_v28, 0.0  ;;  %v718_v35 = vmax.f32 %v654_v29, 0.0 }
 0x121   : > { %v1157_v36 = vpack.c.bf16 %v702_v34, %v701_v32  ;;  %v1197_v37 = vpack.c.bf16 %v718_v35, %v717_v33 }
 0x122   : > { %v594_v38 = vpop.f32.mrb[12].mxu0  ;;  %v658_v39 = vpop.f32.mrb[12].mxu1 }
 0x123   : > { %1225 = vst [vmem:[%s1632_s11 + $0x10] sm:$0xff] %v1157_v36   ;;  %1233 = vst [vmem:[%s1632_s11 + $0x50] sm:$0xff] %v1197_v37   ;;  %v595_v40 = vadd.f32 %v1623_v47, %v594_v38  ;;  %v659_v41 = vadd.f32 %v1623_v47, %v658_v39  ;;  %v596_v42 = vpop.f32.mrb[13].mxu0  ;;  %v660_v43 = vpop.f32.mrb[13].mxu1 }
 0x124   : > { %v597_v44 = vpop.f32.mrb[14].mxu0  ;;  %v661_v45 = vpop.f32.mrb[14].mxu1 }
 0x125   : > { %v598_v46 = vadd.f32 %v1623_v47, %v597_v44  ;;  %v662_v48 = vadd.f32 %v1623_v47, %v661_v45  ;;  %v599_v49 = vpop.f32.mrb[15].mxu0  ;;  %v663_v50 = vpop.f32.mrb[15].mxu1  ;;  %v703_v51 = vmax.f32 %v595_v40, 0.0  ;;  %v719_v52 = vmax.f32 %v659_v41, 0.0 }
 0x127   : > { %v704_v53 = vmax.f32 %v598_v46, 0.0  ;;  %v720_v54 = vmax.f32 %v662_v48, 0.0 }
 0x129   : > { %v1162_v55 = vpack.c.bf16 %v704_v53, %v703_v51  ;;  %v1202_v56 = vpack.c.bf16 %v720_v54, %v719_v52 }
 0x12a   : > { %v602_v57 = vpop.f32.mrb[16].mxu0  ;;  %v666_v58 = vpop.f32.mrb[16].mxu1 }
 0x12b   : > { %1226 = vst [vmem:[%s1632_s11 + $0x18] sm:$0xff] %v1162_v55   ;;  %1234 = vst [vmem:[%s1632_s11 + $0x58] sm:$0xff] %v1202_v56   ;;  %v603_v59 = vadd.f32 %v1623_v47, %v602_v57  ;;  %v667_v60 = vadd.f32 %v1623_v47, %v666_v58  ;;  %v604_v61 = vpop.f32.mrb[17].mxu0  ;;  %v668_v62 = vpop.f32.mrb[17].mxu1 }
 0x12c   : > { %v605_v63 = vpop.f32.mrb[18].mxu0  ;;  %v669_v0 = vpop.f32.mrb[18].mxu1 }
 0x12d   : > { %v606_v1 = vadd.f32 %v1623_v47, %v605_v63  ;;  %v670_v2 = vadd.f32 %v1623_v47, %v669_v0  ;;  %v607_v3 = vpop.f32.mrb[19].mxu0  ;;  %v671_v4 = vpop.f32.mrb[19].mxu1  ;;  %v705_v5 = vmax.f32 %v603_v59, 0.0  ;;  %v721_v6 = vmax.f32 %v667_v60, 0.0 }
 0x12f   : > { %v706_v7 = vmax.f32 %v606_v1, 0.0  ;;  %v722_v8 = vmax.f32 %v670_v2, 0.0 }
 0x131   : > { %v1167_v9 = vpack.c.bf16 %v706_v7, %v705_v5  ;;  %v1207_v10 = vpack.c.bf16 %v722_v8, %v721_v6 }
 0x132   : > { %v610_v11 = vpop.f32.mrb[20].mxu0  ;;  %v674_v12 = vpop.f32.mrb[20].mxu1 }
 0x133   : > { %1227 = vst [vmem:[%s1632_s11 + $0x20] sm:$0xff] %v1167_v9   ;;  %1235 = vst [vmem:[%s1632_s11 + $0x60] sm:$0xff] %v1207_v10   ;;  %v611_v13 = vadd.f32 %v1623_v47, %v610_v11  ;;  %v675_v14 = vadd.f32 %v1623_v47, %v674_v12  ;;  %v612_v15 = vpop.f32.mrb[21].mxu0  ;;  %v676_v16 = vpop.f32.mrb[21].mxu1 }
 0x134   : > { %v613_v17 = vpop.f32.mrb[22].mxu0  ;;  %v677_v18 = vpop.f32.mrb[22].mxu1 }
 0x135   : > { %v614_v19 = vadd.f32 %v1623_v47, %v613_v17  ;;  %v678_v20 = vadd.f32 %v1623_v47, %v677_v18  ;;  %v615_v21 = vpop.f32.mrb[23].mxu0  ;;  %v679_v22 = vpop.f32.mrb[23].mxu1  ;;  %v707_v23 = vmax.f32 %v611_v13, 0.0  ;;  %v723_v24 = vmax.f32 %v675_v14, 0.0 }
 0x137   : > { %v708_v25 = vmax.f32 %v614_v19, 0.0  ;;  %v724_v26 = vmax.f32 %v678_v20, 0.0 }
 0x139   : > { %v1172_v27 = vpack.c.bf16 %v708_v25, %v707_v23  ;;  %v1212_v28 = vpack.c.bf16 %v724_v26, %v723_v24 }
 0x13a   : > { %v618_v29 = vpop.f32.mrb[24].mxu0  ;;  %v682_v30 = vpop.f32.mrb[24].mxu1 }
 0x13b   : > { %1228 = vst [vmem:[%s1632_s11 + $0x28] sm:$0xff] %v1172_v27   ;;  %1236 = vst [vmem:[%s1632_s11 + $0x68] sm:$0xff] %v1212_v28   ;;  %v619_v31 = vadd.f32 %v1623_v47, %v618_v29  ;;  %v683_v32 = vadd.f32 %v1623_v47, %v682_v30  ;;  %v620_v33 = vpop.f32.mrb[25].mxu0  ;;  %v684_v34 = vpop.f32.mrb[25].mxu1 }
 0x13c   : > { %v621_v35 = vpop.f32.mrb[26].mxu0  ;;  %v685_v36 = vpop.f32.mrb[26].mxu1 }
 0x13d   : > { %v622_v37 = vadd.f32 %v1623_v47, %v621_v35  ;;  %v686_v38 = vadd.f32 %v1623_v47, %v685_v36  ;;  %v623_v39 = vpop.f32.mrb[27].mxu0  ;;  %v687_v40 = vpop.f32.mrb[27].mxu1  ;;  %v709_v41 = vmax.f32 %v619_v31, 0.0  ;;  %v725_v42 = vmax.f32 %v683_v32, 0.0 }
 0x13f   : > { %v710_v43 = vmax.f32 %v622_v37, 0.0  ;;  %v726_v44 = vmax.f32 %v686_v38, 0.0 }
 0x141   : > { %v1177_v45 = vpack.c.bf16 %v710_v43, %v709_v41  ;;  %v1217_v46 = vpack.c.bf16 %v726_v44, %v725_v42 }
 0x142   : > { %v626_v48 = vpop.f32.mrb[28].mxu0  ;;  %v690_v49 = vpop.f32.mrb[28].mxu1 }
 0x143   : > { %1229 = vst [vmem:[%s1632_s11 + $0x30] sm:$0xff] %v1177_v45   ;;  %1237 = vst [vmem:[%s1632_s11 + $0x70] sm:$0xff] %v1217_v46   ;;  %v627_v50 = vadd.f32 %v1623_v47, %v626_v48  ;;  %v691_v51 = vadd.f32 %v1623_v47, %v690_v49  ;;  %v628_v52 = vpop.f32.mrb[29].mxu0  ;;  %v692_v53 = vpop.f32.mrb[29].mxu1 }
 0x144   : > { %v629_v54 = vpop.f32.mrb[30].mxu0  ;;  %v693_v55 = vpop.f32.mrb[30].mxu1 }
 0x145   : > { %v630_v56 = vadd.f32 %v1623_v47, %v629_v54  ;;  %v694_v57 = vadd.f32 %v1623_v47, %v693_v55  ;;  %v631_v58 = vpop.f32.mrb[31].mxu0  ;;  %v695_v59 = vpop.f32.mrb[31].mxu1  ;;  %v711_v60 = vmax.f32 %v627_v50, 0.0  ;;  %v727_v61 = vmax.f32 %v691_v51, 0.0 }
 0x147   : > { %v712_v62 = vmax.f32 %v630_v56, 0.0  ;;  %v728_v63 = vmax.f32 %v694_v57, 0.0 }
 0x149   : > { %v1182_v47 = vpack.c.bf16 %v712_v62, %v711_v60  ;;  %v1222_v0 = vpack.c.bf16 %v728_v63, %v727_v61 }
 0x14b   : > { %1230 = vst [vmem:[%s1632_s11 + $0x38] sm:$0xff] %v1182_v47   ;;  %1238 = vst [vmem:[%s1632_s11 + $0x78] sm:$0xff] %v1222_v0  }
 0x14c   : > { %1389 = shalt.err (!%p1386_p5)
}
 0x14d   : > { %s1390_s4 = scalar_lea.hbm %s1681_s26, 2048  ;;  %s1394_s7 = scalar_lea.hbm %s1738_s3, 16384 }
 0x14e   : > { %p1391_p6 = scmp.ne.s32.totalorder %s1681_s26, %s1390_s4  ;;  %p1395_p10 = scmp.lt.u32.totalorder %s1681_s26, %s1738_s3 }
 0x14f   : > { %p1396_p11 = scmp.lt.u32.totalorder %s1394_s7, %s1390_s4  ;;  %p1398_p13 = scmp.lt.u32.totalorder %s1390_s4, %s1681_s26 }
 0x150   : > { %p1392_p7 = pnand %p1391_p6, %p1521_p4 }
 0x151   : > { %p1397_p12 = por %p1396_p11, %p1395_p10 }
 0x152   : > { %p1393_p9 = pneg %p1392_p7 }
 0x153   : > { %p1399_p0 = por %p1398_p13, %p1397_p12 }
 0x155   : > { %p1400_p1 = pnand %p1399_p0, %p1393_p9 }
 0x157   : > { %1403 = shalt.err (!%p1400_p1)
}
 0x158   : > { %s1459_s10 = smov 64   ;;  %s1460_s11 = smov 4  }
 0x159   : > { %1259 = dma.vmem_to_hbm [thread:$0]  (%p1521_p4), %s1683_s19, 2048, %s1681_s26, %s1689_s15, %s1459_s10, %s1459_s10, %s1460_s11  }
 0x15a PF: > { %p1265_p2 = scmp.ge.s32.totalorder %s1454_s17, 2  ;;  %s919_s18 = sand.u32 1, %s1434_s12  }
 0x15b   : > { %s920_s21 = scalar_lea.sflag [#allocation3], %s919_s18 }
 0x15c   : > { %p1262_p3 = pnand %p1265_p2, %p1528_p8 }
 0x15e   : > { %1429 = dma.done.wait (!%p1262_p3), %s920_s21, 2048  }
 0x15f   : > { %1431 = vsyncadd (!%p1262_p3), %s920_s21, 4294965248  ;;  %s16_s17 = sadd.s32 1, %s1454_s17   ;;  %s1741_s12 = smov %s1438_s13 }
 0x160   : > { %p13_p5 = scmp.ge.s32.totalorder %s16_s17, 10   ;;  %s1742_s13 = smov %s1442_s14 }
 0x161   : > { %s1743_s14 = smov %s1534_s25  ;;  %s1744_s15 = smov %s1450_s16 }
 0x162   : > { %s1745_s16 = smov %s1747_s20  ;;  %15 = sbr.rel (!%p13_p5) target bundleno = 4 (0x4), region = 73 }
 0x169   :  { %925 = vsyncpa [#allocation3], 1 }
 0x16a   :  { %927 = vsyncpa [#allocation3 + $0x1], 1 }

</bundles_post_ra>
